<compile_context>
chip_gen: v6e
topology: v6e:2x2x1
jax: 0.10.0
libtpu: 0.0.40
codegen_flags: <defaults>
</compile_context>

<pallas_src>
import math

import jax
import jax.numpy as jnp
from jax.experimental import pallas as pl
from jax.experimental.pallas import tpu as pltpu


def _softmax_last(x):
    """Numerically-stable softmax over the last (lane) axis."""
    m = jnp.max(x, axis=-1, keepdims=True)
    e = jnp.exp(x - m)
    return e / jnp.sum(e, axis=-1, keepdims=True)


def _alignment_kernel(a_ref, am_ref, amt_ref, b_ref, bm_ref, bmt_ref,
                      w1_ref, b1_ref, w2_ref, b2_ref, temp_ref,
                      a_feat_ref, b_feat_ref):
    # a_ref:  (BG, La, D)   am_ref: (BG, La, 1)   amt_ref: (BG, 1, La)
    # b_ref:  (BG, Lb, D)   bm_ref: (BG, Lb, 1)   bmt_ref: (BG, 1, Lb)
    # w1_ref/w2_ref: (D, H) b1_ref/b2_ref: (1, H) temp_ref: (1,) in SMEM
    BG, La, D = a_ref.shape
    _, Lb, _ = b_ref.shape

    a = a_ref[...].astype(jnp.float32)            # (BG, La, D)
    b = b_ref[...].astype(jnp.float32)            # (BG, Lb, D)
    temp = temp_ref[0]                            # scalar from SMEM

    # Linear + ReLU projections as single large MXU matmuls
    # (leading-dim-only reshapes: last dim unchanged -> free).
    a2 = a.reshape(BG * La, D)
    b2 = b.reshape(BG * Lb, D)
    a_out = jnp.maximum(
        jnp.dot(a2, w1_ref[...], preferred_element_type=jnp.float32) + b1_ref[...], 0.0)
    b_out = jnp.maximum(
        jnp.dot(b2, w2_ref[...], preferred_element_type=jnp.float32) + b2_ref[...], 0.0)
    # Fold temperature onto the small (BG*La, H) tensor instead of the
    # (BG, La, Lb) attention tensor.
    a_out = (a_out * temp).reshape(BG, La, -1)    # (BG, La, H)
    b_out = b_out.reshape(BG, Lb, -1)             # (BG, Lb, H)

    # Attention logits in both orientations; both einsums contract the last
    # dims (no transposes anywhere in the kernel).
    att = jnp.einsum('bah,bkh->bak', a_out, b_out,
                     preferred_element_type=jnp.float32)     # (BG, La, Lb)
    att_t = jnp.einsum('bkh,bah->bka', b_out, a_out,
                       preferred_element_type=jnp.float32)   # (BG, Lb, La)

    # Attention mask via VPU broadcast products (no MXU rank-1 matmul).
    am = am_ref[...].astype(jnp.float32)          # (BG, La, 1)
    amt = amt_ref[...].astype(jnp.float32)        # (BG, 1, La)
    bm = bm_ref[...].astype(jnp.float32)          # (BG, Lb, 1)
    bmt = bmt_ref[...].astype(jnp.float32)        # (BG, 1, Lb)
    mask = am * bmt                               # (BG, La, Lb)
    mask_t = bm * amt                             # (BG, Lb, La)

    neg = jnp.float32(-1e9)
    att = mask * att + (1.0 - mask) * neg
    att_t = mask_t * att_t + (1.0 - mask_t) * neg

    # Both softmaxes are over the last (lane) axis.
    b_att = _softmax_last(att)      # == softmax(att, dim=2)
    a_att_t = _softmax_last(att_t)  # == softmax(att, dim=1), pre-transposed

    # a_feature = a_attention^T @ a_inputs -> (BG, Lb, D)
    a_feat = jnp.einsum('bka,bad->bkd', a_att_t, a,
                        preferred_element_type=jnp.float32)
    # b_feature = b_attention @ b_inputs   -> (BG, La, D)
    b_feat = jnp.einsum('bak,bkd->bad', b_att, b,
                        preferred_element_type=jnp.float32)

    a_feat_ref[...] = a_feat.astype(a_feat_ref.dtype)
    b_feat_ref[...] = b_feat.astype(b_feat_ref.dtype)


def _choose_block_b(B, La, Lb, D, H, max_vmem_bytes=8 << 20, max_block=8):
    """Batch elements per grid step.

    VMEM-aware (rough f32 live-set estimate) and keeps >= 2 grid steps when
    B >= 2 so the parallel grid axis can be split across TensorCores.
    """
    if B <= 1:
        return 1
    per_b = 4 * (2 * (La * D + Lb * D)   # inputs + outputs
                 + 2 * La * Lb           # logits in both orientations
                 + La * H + Lb * H       # projections
                 + 2 * (La + Lb))        # masks (both views)
    fit = max(1, max_vmem_bytes // max(per_b, 1))
    return int(max(1, min(fit, max_block, B // 2)))


def alignment_forward(a_inputs, a_mask, b_inputs, b_mask,
                      w1, b1, w2, b2, temperature, *, block_b=None):
    """Pallas implementation of Alignment.forward (align_type='linear')."""
    B, La, D = a_inputs.shape
    _, Lb, _ = b_inputs.shape
    H = w1.shape[1]
    assert w1.shape == (D, H) and w2.shape == (D, H)

    if block_b is None:
        block_b = _choose_block_b(B, La, Lb, D, H)
    grid_b = pl.cdiv(B, block_b)
    B_pad = grid_b * block_b

    a_in, b_in, am, bm = a_inputs, b_inputs, a_mask, b_mask
    if B_pad != B:
        pad = ((0, B_pad - B), (0, 0), (0, 0))
        a_in = jnp.pad(a_in, pad)
        b_in = jnp.pad(b_in, pad)
        am = jnp.pad(am, pad)   # zero mask on padded rows -> uniform softmax, sliced off
        bm = jnp.pad(bm, pad)

    # Transposed mask views (size-1 dim move: pure reshape, done in XLA).
    amt = am.reshape(B_pad, 1, La)
    bmt = bm.reshape(B_pad, 1, Lb)

    b1_2d = b1.reshape(1, H)
    b2_2d = b2.reshape(1, H)
    temp_1d = jnp.asarray(temperature, jnp.float32).reshape(1)

    out_shapes = (
        jax.ShapeDtypeStruct((B_pad, Lb, D), a_inputs.dtype),  # a_feature
        jax.ShapeDtypeStruct((B_pad, La, D), b_inputs.dtype),  # b_feature
    )

    grid_spec = pltpu.PrefetchScalarGridSpec(
        num_scalar_prefetch=0,
        grid=(grid_b,),
        in_specs=[
            pl.BlockSpec((block_b, La, D), lambda i: (i, 0, 0)),   # a_inputs
            pl.BlockSpec((block_b, La, 1), lambda i: (i, 0, 0)),   # a_mask
            pl.BlockSpec((block_b, 1, La), lambda i: (i, 0, 0)),   # a_mask^T
            pl.BlockSpec((block_b, Lb, D), lambda i: (i, 0, 0)),   # b_inputs
            pl.BlockSpec((block_b, Lb, 1), lambda i: (i, 0, 0)),   # b_mask
            pl.BlockSpec((block_b, 1, Lb), lambda i: (i, 0, 0)),   # b_mask^T
            pl.BlockSpec((D, H), lambda i: (0, 0)),                # w1
            pl.BlockSpec((1, H), lambda i: (0, 0)),                # b1
            pl.BlockSpec((D, H), lambda i: (0, 0)),                # w2
            pl.BlockSpec((1, H), lambda i: (0, 0)),                # b2
            pl.BlockSpec(memory_space=pltpu.MemorySpace.SMEM),     # temperature
        ],
        out_specs=[
            pl.BlockSpec((block_b, Lb, D), lambda i: (i, 0, 0)),   # a_feature
            pl.BlockSpec((block_b, La, D), lambda i: (i, 0, 0)),   # b_feature
        ],
    )

    a_feat, b_feat = pl.pallas_call(
        _alignment_kernel,
        out_shape=out_shapes,
        grid_spec=grid_spec,
        compiler_params=pltpu.CompilerParams(
            dimension_semantics=("parallel",)),
    )(a_in, am, amt, b_in, bm, bmt, w1, b1_2d, w2, b2_2d, temp_1d)

    if B_pad != B:
        a_feat = a_feat[:B]
        b_feat = b_feat[:B]
    return a_feat, b_feat


def alignment_reference(a_inputs, a_mask, b_inputs, b_mask,
                        w1, b1, w2, b2, temperature):
    """Plain-JAX reference matching the PyTorch forward (eval mode)."""
    a_out = jax.nn.relu(jnp.einsum('bld,dh->blh', a_inputs, w1) + b1)
    b_out = jax.nn.relu(jnp.einsum('bld,dh->blh', b_inputs, w2) + b2)
    att = jnp.einsum('bah,bkh->bak', a_out, b_out) * temperature
    mask = jnp.einsum('bai,bki->bak', a_mask, b_mask)
    att = mask * att + (1.0 - mask) * (-1e9)
    a_att = jax.nn.softmax(att, axis=1)
    b_att = jax.nn.softmax(att, axis=2)
    a_feat = jnp.einsum('bak,bad->bkd', a_att, a_inputs)
    b_feat = jnp.einsum('bak,bkd->bad', b_att, b_inputs)
    return a_feat, b_feat


if __name__ == "__main__":
    embedding_size = 24
    hidden_size = 8
    D = embedding_size + hidden_size  # 32

    def make_case(case_key, B, La, Lb):
        k_a, k_b, k_w1, k_b1, k_w2, k_b2 = jax.random.split(case_key, 6)
        a_inputs = jax.random.normal(k_a, (B, La, D), dtype=jnp.float32)
        b_inputs = jax.random.normal(k_b, (B, Lb, D), dtype=jnp.float32)
        # masks: 1.0 for "on" positions, 0.0 for masked-out positions
        a_mask = jnp.ones((B, La, 1), jnp.float32).at[:, -2:, :].set(0.0)
        b_mask = jnp.ones((B, Lb, 1), jnp.float32).at[:, -1:, :].set(0.0)
        # PyTorch-Linear-style uniform init, stored as (in, out) so kernel does x @ W + b.
        bound = 1.0 / math.sqrt(D)
        w1 = jax.random.uniform(k_w1, (D, hidden_size), jnp.float32, -bound, bound)
        b1 = jax.random.uniform(k_b1, (hidden_size,), jnp.float32, -bound, bound)
        w2 = jax.random.uniform(k_w2, (D, hidden_size), jnp.float32, -bound, bound)
        b2 = jax.random.uniform(k_b2, (hidden_size,), jnp.float32, -bound, bound)
        temperature = jnp.float32(math.sqrt(1.0 / hidden_size))
        return (a_inputs, a_mask, b_inputs, b_mask, w1, b1, w2, b2, temperature)

    key = jax.random.PRNGKey(0)
    k1, k2, k3 = jax.random.split(key, 3)

    fwd = jax.jit(alignment_forward)

    cases = [
        (make_case(k1, 2, 8, 8), (2, 8, 8)),     # grid = 2, block_b = 1
        (make_case(k2, 5, 8, 8), (5, 8, 8)),     # block_b = 2, padded batch path
        (make_case(k3, 4, 16, 12), (4, 16, 12)), # asymmetric seq lengths
    ]

    for args, (B, La, Lb) in cases:
        a_feat, b_feat = fwd(*args)
        jax.block_until_ready((a_feat, b_feat))

        a_ref_out, b_ref_out = alignment_reference(*args)
        assert a_feat.shape == (B, Lb, D) and b_feat.shape == (B, La, D)
        assert jnp.allclose(a_feat, a_ref_out, atol=1e-4, rtol=1e-4)
        assert jnp.allclose(b_feat, b_ref_out, atol=1e-4, rtol=1e-4)

    print("KERNEL_OK")
</pallas_src>

<mosaic_0001>
module attributes {stable_mosaic.version = 11 : i64} {
  func.func @_alignment_kernel(%arg0: i32, %arg1: memref<1x8x32xf32, #tpu.memory_space<vmem>>, %arg2: memref<1x8x1xf32, #tpu.memory_space<vmem>>, %arg3: memref<1x1x8xf32, #tpu.memory_space<vmem>>, %arg4: memref<1x8x32xf32, #tpu.memory_space<vmem>>, %arg5: memref<1x8x1xf32, #tpu.memory_space<vmem>>, %arg6: memref<1x1x8xf32, #tpu.memory_space<vmem>>, %arg7: memref<32x8xf32, #tpu.memory_space<vmem>>, %arg8: memref<1x8xf32, #tpu.memory_space<vmem>>, %arg9: memref<32x8xf32, #tpu.memory_space<vmem>>, %arg10: memref<1x8xf32, #tpu.memory_space<vmem>>, %arg11: memref<1xf32, #tpu.memory_space<smem>>, %arg12: memref<1x8x32xf32, #tpu.memory_space<vmem>>, %arg13: memref<1x8x32xf32, #tpu.memory_space<vmem>>) attributes {dimension_semantics = [#tpu.dimension_semantics<parallel>], iteration_bounds = array<i64: 2>, scalar_prefetch = 0 : i64, scratch_operands = 0 : i64, tpu.core_type = #tpu.core_type<tc>, window_params = [{transform_indices = @transform_0, window_bounds = array<i64: 1, 8, 32>}, {transform_indices = @transform_1, window_bounds = array<i64: 1, 8, 1>}, {transform_indices = @transform_2, window_bounds = array<i64: 1, 1, 8>}, {transform_indices = @transform_3, window_bounds = array<i64: 1, 8, 32>}, {transform_indices = @transform_4, window_bounds = array<i64: 1, 8, 1>}, {transform_indices = @transform_5, window_bounds = array<i64: 1, 1, 8>}, {pipeline_mode = #tpu.pipeline_mode<synchronous>, transform_indices = @transform_6, window_bounds = array<i64: 32, 8>}, {pipeline_mode = #tpu.pipeline_mode<synchronous>, transform_indices = @transform_7, window_bounds = array<i64: 1, 8>}, {pipeline_mode = #tpu.pipeline_mode<synchronous>, transform_indices = @transform_8, window_bounds = array<i64: 32, 8>}, {pipeline_mode = #tpu.pipeline_mode<synchronous>, transform_indices = @transform_9, window_bounds = array<i64: 1, 8>}, {transform_indices = @transform_10, window_bounds = array<i64: 1>}, {transform_indices = @transform_11, window_bounds = array<i64: 1, 8, 32>}, {transform_indices = @transform_12, window_bounds = array<i64: 1, 8, 32>}]} {
    %c0 = arith.constant 0 : index
    %c0_0 = arith.constant 0 : index
    %c0_1 = arith.constant 0 : index
    %0 = vector.load %arg1[%c0, %c0_0, %c0_1] : memref<1x8x32xf32, #tpu.memory_space<vmem>>, vector<1x8x32xf32>
    %c0_2 = arith.constant 0 : index
    %c0_3 = arith.constant 0 : index
    %c0_4 = arith.constant 0 : index
    %1 = vector.load %arg4[%c0_2, %c0_3, %c0_4] : memref<1x8x32xf32, #tpu.memory_space<vmem>>, vector<1x8x32xf32>
    %c0_5 = arith.constant 0 : index
    %2 = memref.load %arg11[%c0_5] : memref<1xf32, #tpu.memory_space<smem>>
    %3 = vector.shape_cast %0 : vector<1x8x32xf32> to vector<8x32xf32>
    %4 = vector.shape_cast %1 : vector<1x8x32xf32> to vector<8x32xf32>
    %c0_6 = arith.constant 0 : index
    %c0_7 = arith.constant 0 : index
    %5 = vector.load %arg7[%c0_6, %c0_7] : memref<32x8xf32, #tpu.memory_space<vmem>>, vector<32x8xf32>
    %cst = arith.constant dense<0.000000e+00> : vector<8x8xf32>
    %6 = tpu.matmul %3, %5, %cst {dimension_numbers = #tpu.dot_dimension_numbers<[1], [0], [0], [1], [0, 0, 1, 1], [], []>} : vector<8x32xf32>, vector<32x8xf32>, vector<8x8xf32> -> vector<8x8xf32>
    %c0_8 = arith.constant 0 : index
    %c0_9 = arith.constant 0 : index
    %7 = vector.load %arg8[%c0_8, %c0_9] : memref<1x8xf32, #tpu.memory_space<vmem>>, vector<1x8xf32>
    %8 = vector.broadcast %7 : vector<1x8xf32> to vector<8x8xf32>
    %9 = arith.addf %6, %8 : vector<8x8xf32>
    %cst_10 = arith.constant 0.000000e+00 : f32
    %10 = vector.broadcast %cst_10 : f32 to vector<8x8xf32>
    %11 = arith.maximumf %9, %10 : vector<8x8xf32>
    %c0_11 = arith.constant 0 : index
    %c0_12 = arith.constant 0 : index
    %12 = vector.load %arg9[%c0_11, %c0_12] : memref<32x8xf32, #tpu.memory_space<vmem>>, vector<32x8xf32>
    %cst_13 = arith.constant dense<0.000000e+00> : vector<8x8xf32>
    %13 = tpu.matmul %4, %12, %cst_13 {dimension_numbers = #tpu.dot_dimension_numbers<[1], [0], [0], [1], [0, 0, 1, 1], [], []>} : vector<8x32xf32>, vector<32x8xf32>, vector<8x8xf32> -> vector<8x8xf32>
    %c0_14 = arith.constant 0 : index
    %c0_15 = arith.constant 0 : index
    %14 = vector.load %arg10[%c0_14, %c0_15] : memref<1x8xf32, #tpu.memory_space<vmem>>, vector<1x8xf32>
    %15 = vector.broadcast %14 : vector<1x8xf32> to vector<8x8xf32>
    %16 = arith.addf %13, %15 : vector<8x8xf32>
    %cst_16 = arith.constant 0.000000e+00 : f32
    %17 = vector.broadcast %cst_16 : f32 to vector<8x8xf32>
    %18 = arith.maximumf %16, %17 : vector<8x8xf32>
    %19 = vector.broadcast %2 : f32 to vector<8x8xf32>
    %20 = arith.mulf %11, %19 : vector<8x8xf32>
    %21 = vector.shape_cast %20 : vector<8x8xf32> to vector<1x8x8xf32>
    %22 = vector.shape_cast %18 : vector<8x8xf32> to vector<1x8x8xf32>
    "tpu.trace_start"() <{level = 10 : i32, message = "bah,bkh->bak"}> : () -> ()
    %cst_17 = arith.constant dense<0.000000e+00> : vector<1x8x8xf32>
    %23 = tpu.matmul %21, %22, %cst_17 {dimension_numbers = #tpu.dot_dimension_numbers<[2], [2], [1], [1], [0, 0, 0, 1, 1, 1], [0], [0]>} : vector<1x8x8xf32>, vector<1x8x8xf32>, vector<1x8x8xf32> -> vector<1x8x8xf32>
    "tpu.trace_stop"() : () -> ()
    "tpu.trace_start"() <{level = 10 : i32, message = "bkh,bah->bka"}> : () -> ()
    %cst_18 = arith.constant dense<0.000000e+00> : vector<1x8x8xf32>
    %24 = tpu.matmul %22, %21, %cst_18 {dimension_numbers = #tpu.dot_dimension_numbers<[2], [2], [1], [1], [0, 0, 0, 1, 1, 1], [0], [0]>} : vector<1x8x8xf32>, vector<1x8x8xf32>, vector<1x8x8xf32> -> vector<1x8x8xf32>
    "tpu.trace_stop"() : () -> ()
    %c0_19 = arith.constant 0 : index
    %c0_20 = arith.constant 0 : index
    %c0_21 = arith.constant 0 : index
    %25 = vector.load %arg2[%c0_19, %c0_20, %c0_21] : memref<1x8x1xf32, #tpu.memory_space<vmem>>, vector<1x8x1xf32>
    %c0_22 = arith.constant 0 : index
    %c0_23 = arith.constant 0 : index
    %c0_24 = arith.constant 0 : index
    %26 = vector.load %arg3[%c0_22, %c0_23, %c0_24] : memref<1x1x8xf32, #tpu.memory_space<vmem>>, vector<1x1x8xf32>
    %c0_25 = arith.constant 0 : index
    %c0_26 = arith.constant 0 : index
    %c0_27 = arith.constant 0 : index
    %27 = vector.load %arg5[%c0_25, %c0_26, %c0_27] : memref<1x8x1xf32, #tpu.memory_space<vmem>>, vector<1x8x1xf32>
    %c0_28 = arith.constant 0 : index
    %c0_29 = arith.constant 0 : index
    %c0_30 = arith.constant 0 : index
    %28 = vector.load %arg6[%c0_28, %c0_29, %c0_30] : memref<1x1x8xf32, #tpu.memory_space<vmem>>, vector<1x1x8xf32>
    %29 = vector.broadcast %25 : vector<1x8x1xf32> to vector<1x8x8xf32>
    %30 = vector.broadcast %28 : vector<1x1x8xf32> to vector<1x8x8xf32>
    %31 = arith.mulf %29, %30 : vector<1x8x8xf32>
    %32 = vector.broadcast %27 : vector<1x8x1xf32> to vector<1x8x8xf32>
    %33 = vector.broadcast %26 : vector<1x1x8xf32> to vector<1x8x8xf32>
    %34 = arith.mulf %32, %33 : vector<1x8x8xf32>
    %35 = arith.mulf %31, %23 : vector<1x8x8xf32>
    %cst_31 = arith.constant 1.000000e+00 : f32
    %36 = vector.broadcast %cst_31 : f32 to vector<1x8x8xf32>
    %37 = arith.subf %36, %31 : vector<1x8x8xf32>
    %cst_32 = arith.constant -1.000000e+09 : f32
    %38 = vector.broadcast %cst_32 : f32 to vector<1x8x8xf32>
    %39 = arith.mulf %37, %38 : vector<1x8x8xf32>
    %40 = arith.addf %35, %39 : vector<1x8x8xf32>
    %41 = arith.mulf %34, %24 : vector<1x8x8xf32>
    %cst_33 = arith.constant 1.000000e+00 : f32
    %42 = vector.broadcast %cst_33 : f32 to vector<1x8x8xf32>
    %43 = arith.subf %42, %34 : vector<1x8x8xf32>
    %cst_34 = arith.constant -1.000000e+09 : f32
    %44 = vector.broadcast %cst_34 : f32 to vector<1x8x8xf32>
    %45 = arith.mulf %43, %44 : vector<1x8x8xf32>
    %46 = arith.addf %41, %45 : vector<1x8x8xf32>
    %cst_35 = arith.constant dense<0xFF800000> : vector<1x8xf32>
    %47 = vector.multi_reduction <maximumf>, %40, %cst_35 [2] : vector<1x8x8xf32> to vector<1x8xf32>
    %48 = vector.shape_cast %47 : vector<1x8xf32> to vector<1x8x1xf32>
    %49 = vector.broadcast %48 : vector<1x8x1xf32> to vector<1x8x8xf32>
    %50 = arith.subf %40, %49 : vector<1x8x8xf32>
    %51 = math.exp %50 : vector<1x8x8xf32>
    %cst_36 = arith.constant dense<0.000000e+00> : vector<1x8xf32>
    %52 = vector.multi_reduction <add>, %51, %cst_36 [2] : vector<1x8x8xf32> to vector<1x8xf32>
    %53 = vector.shape_cast %52 : vector<1x8xf32> to vector<1x8x1xf32>
    %54 = vector.broadcast %53 : vector<1x8x1xf32> to vector<1x8x8xf32>
    %55 = arith.divf %51, %54 : vector<1x8x8xf32>
    %cst_37 = arith.constant dense<0xFF800000> : vector<1x8xf32>
    %56 = vector.multi_reduction <maximumf>, %46, %cst_37 [2] : vector<1x8x8xf32> to vector<1x8xf32>
    %57 = vector.shape_cast %56 : vector<1x8xf32> to vector<1x8x1xf32>
    %58 = vector.broadcast %57 : vector<1x8x1xf32> to vector<1x8x8xf32>
    %59 = arith.subf %46, %58 : vector<1x8x8xf32>
    %60 = math.exp %59 : vector<1x8x8xf32>
    %cst_38 = arith.constant dense<0.000000e+00> : vector<1x8xf32>
    %61 = vector.multi_reduction <add>, %60, %cst_38 [2] : vector<1x8x8xf32> to vector<1x8xf32>
    %62 = vector.shape_cast %61 : vector<1x8xf32> to vector<1x8x1xf32>
    %63 = vector.broadcast %62 : vector<1x8x1xf32> to vector<1x8x8xf32>
    %64 = arith.divf %60, %63 : vector<1x8x8xf32>
    "tpu.trace_start"() <{level = 10 : i32, message = "bka,bad->bkd"}> : () -> ()
    %cst_39 = arith.constant dense<0.000000e+00> : vector<1x8x32xf32>
    %65 = tpu.matmul %64, %0, %cst_39 {dimension_numbers = #tpu.dot_dimension_numbers<[2], [1], [1], [2], [0, 0, 0, 1, 1, 2], [0], [0]>} : vector<1x8x8xf32>, vector<1x8x32xf32>, vector<1x8x32xf32> -> vector<1x8x32xf32>
    "tpu.trace_stop"() : () -> ()
    "tpu.trace_start"() <{level = 10 : i32, message = "bak,bkd->bad"}> : () -> ()
    %cst_40 = arith.constant dense<0.000000e+00> : vector<1x8x32xf32>
    %66 = tpu.matmul %55, %1, %cst_40 {dimension_numbers = #tpu.dot_dimension_numbers<[2], [1], [1], [2], [0, 0, 0, 1, 1, 2], [0], [0]>} : vector<1x8x8xf32>, vector<1x8x32xf32>, vector<1x8x32xf32> -> vector<1x8x32xf32>
    "tpu.trace_stop"() : () -> ()
    %c0_41 = arith.constant 0 : index
    %c0_42 = arith.constant 0 : index
    %c0_43 = arith.constant 0 : index
    %67 = vector.load %arg12[%c0_41, %c0_42, %c0_43] : memref<1x8x32xf32, #tpu.memory_space<vmem>>, vector<1x8x32xf32>
    tpu.vector_store %arg12[%c0_41, %c0_42, %c0_43], %65 {strides = array<i32>} : memref<1x8x32xf32, #tpu.memory_space<vmem>>, vector<1x8x32xf32>,
    %c0_44 = arith.constant 0 : index
    %c0_45 = arith.constant 0 : index
    %c0_46 = arith.constant 0 : index
    %68 = vector.load %arg13[%c0_44, %c0_45, %c0_46] : memref<1x8x32xf32, #tpu.memory_space<vmem>>, vector<1x8x32xf32>
    tpu.vector_store %arg13[%c0_44, %c0_45, %c0_46], %66 {strides = array<i32>} : memref<1x8x32xf32, #tpu.memory_space<vmem>>, vector<1x8x32xf32>,
    return
  }
  func.func @transform_0(%arg0: i32) -> (i32, i32, i32) {
    %c0_i32 = arith.constant 0 : i32
    %c0_i32_0 = arith.constant 0 : i32
    %c0_i32_1 = arith.constant 0 : i32
    return %arg0, %c0_i32, %c0_i32_0 : i32, i32, i32
  }
  func.func @transform_1(%arg0: i32) -> (i32, i32, i32) {
    %c0_i32 = arith.constant 0 : i32
    %c0_i32_0 = arith.constant 0 : i32
    %c0_i32_1 = arith.constant 0 : i32
    return %arg0, %c0_i32, %c0_i32_0 : i32, i32, i32
  }
  func.func @transform_2(%arg0: i32) -> (i32, i32, i32) {
    %c0_i32 = arith.constant 0 : i32
    %c0_i32_0 = arith.constant 0 : i32
    %c0_i32_1 = arith.constant 0 : i32
    return %arg0, %c0_i32, %c0_i32_0 : i32, i32, i32
  }
  func.func @transform_3(%arg0: i32) -> (i32, i32, i32) {
    %c0_i32 = arith.constant 0 : i32
    %c0_i32_0 = arith.constant 0 : i32
    %c0_i32_1 = arith.constant 0 : i32
    return %arg0, %c0_i32, %c0_i32_0 : i32, i32, i32
  }
  func.func @transform_4(%arg0: i32) -> (i32, i32, i32) {
    %c0_i32 = arith.constant 0 : i32
    %c0_i32_0 = arith.constant 0 : i32
    %c0_i32_1 = arith.constant 0 : i32
    return %arg0, %c0_i32, %c0_i32_0 : i32, i32, i32
  }
  func.func @transform_5(%arg0: i32) -> (i32, i32, i32) {
    %c0_i32 = arith.constant 0 : i32
    %c0_i32_0 = arith.constant 0 : i32
    %c0_i32_1 = arith.constant 0 : i32
    return %arg0, %c0_i32, %c0_i32_0 : i32, i32, i32
  }
  func.func @transform_6(%arg0: i32) -> (i32, i32) {
    %c0_i32 = arith.constant 0 : i32
    %c0_i32_0 = arith.constant 0 : i32
    %c0_i32_1 = arith.constant 0 : i32
    return %c0_i32, %c0_i32_0 : i32, i32
  }
  func.func @transform_7(%arg0: i32) -> (i32, i32) {
    %c0_i32 = arith.constant 0 : i32
    %c0_i32_0 = arith.constant 0 : i32
    %c0_i32_1 = arith.constant 0 : i32
    return %c0_i32, %c0_i32_0 : i32, i32
  }
  func.func @transform_8(%arg0: i32) -> (i32, i32) {
    %c0_i32 = arith.constant 0 : i32
    %c0_i32_0 = arith.constant 0 : i32
    %c0_i32_1 = arith.constant 0 : i32
    return %c0_i32, %c0_i32_0 : i32, i32
  }
  func.func @transform_9(%arg0: i32) -> (i32, i32) {
    %c0_i32 = arith.constant 0 : i32
    %c0_i32_0 = arith.constant 0 : i32
    %c0_i32_1 = arith.constant 0 : i32
    return %c0_i32, %c0_i32_0 : i32, i32
  }
  func.func @transform_10(%arg0: i32) -> i32 {
    %c0_i32 = arith.constant 0 : i32
    %c0_i32_0 = arith.constant 0 : i32
    return %c0_i32 : i32
  }
  func.func @transform_11(%arg0: i32) -> (i32, i32, i32) {
    %c0_i32 = arith.constant 0 : i32
    %c0_i32_0 = arith.constant 0 : i32
    %c0_i32_1 = arith.constant 0 : i32
    return %arg0, %c0_i32, %c0_i32_0 : i32, i32, i32
  }
  func.func @transform_12(%arg0: i32) -> (i32, i32, i32) {
    %c0_i32 = arith.constant 0 : i32
    %c0_i32_0 = arith.constant 0 : i32
    %c0_i32_1 = arith.constant 0 : i32
    return %arg0, %c0_i32, %c0_i32_0 : i32, i32, i32
  }
}

</mosaic_0001>

<bundles_post_ra>
// kernel: alignment_forward.1
= control target key start
LH: loop header
LB: loop body
LE: loop exit
PB: predicated region body
PF: predicated region fallthrough
CT: control target
= control target key end

     0   :  { %s1750_s0 = inlined_call_operand.vmem [shape: f32[2,8,32], index: 0, kind: input, shape index: {}]   ;;  %s1751_s1 = inlined_call_operand.vmem [shape: f32[2,8,1], index: 1, kind: input, shape index: {}]   ;;  %s1752_s2 = inlined_call_operand.vmem [shape: f32[2,1,8], index: 2, kind: input, shape index: {}]   ;;  %s1753_s3 = inlined_call_operand.vmem [shape: f32[2,8,32], index: 3, kind: input, shape index: {}]   ;;  %s1754_s4 = inlined_call_operand.vmem [shape: f32[2,8,1], index: 4, kind: input, shape index: {}]   ;;  %s1755_s5 = inlined_call_operand.vmem [shape: f32[2,1,8], index: 5, kind: input, shape index: {}]   ;;  %s1756_s6 = inlined_call_operand.vmem [shape: f32[32,8], index: 6, kind: input, shape index: {}]   ;;  %s1757_s7 = inlined_call_operand.vmem [shape: f32[1,8], index: 7, kind: input, shape index: {}]   ;;  %s1758_s8 = inlined_call_operand.vmem [shape: f32[32,8], index: 8, kind: input, shape index: {}]   ;;  %s1759_s9 = inlined_call_operand.vmem [shape: f32[1,8], index: 9, kind: input, shape index: {}]   ;;  %s1760_s10 = inlined_call_operand.<no memory space> [shape: f32[1], index: 10, kind: input, shape index: {}]   ;;  %s1761_s11 = inlined_call_operand.hbm [shape: f32[2,8,32], index: 11, kind: output, shape index: {0}]   ;;  %s1762_s12 = inlined_call_operand.hbm [shape: f32[2,8,32], index: 12, kind: output, shape index: {1}]  }
   0x1   :  { %1765 = sst [smem:[#allocation11_spill]] %s1750_s0 }
   0x2   :  { %1766 = sst [smem:[#allocation12_spill]] %s1751_s1 }
   0x3   :  { %18 = sst [smem:[#allocation2]] %s1760_s10 }
   0x4   :  { %19 = vsyncpa [#allocation4], 0 }
   0x5   :  { %21 = vsyncpa [#allocation4 + $0x1], 0 }
   0x6   :  { %22 = vsyncpa [#allocation6], 0 }
   0x7   :  { %24 = vsyncpa [#allocation6 + $0x1], 0  ;;  %s1515_s23 = smov 0   ;;  %s1517_s24 = smov 0  }
   0x8   :  { %s1519_s25 = smov 0   ;;  %s1521_s26 = smov 0  }
   0x9 LB: > { %1767 = sst [smem:[#allocation9_spill]] %s1436_s25  ;;  %s1536_s10 = sadd.s32 4294967295, %s1440_s26   ;;  %s1440_s26 = sphi %s1521_s26, %s1779_s26   ;;  %s1436_s25 = sphi %s1519_s25, %s1776_s25   ;;  %s1432_s24 = sphi %s1517_s24, %s1778_s24   ;;  %s1428_s23 = sphi %s1515_s23, %s1777_s23  }
   0xa   : > { %s1206_s27 = sadd.s32 4294967294, %s1440_s26   ;;  %s1540_s28 = sadd.s32 1, %s1440_s26  }
   0xb   : > { %s298_s29 = sadd.s32 1, %s1436_s25  ;;  %s295_s30 = ssub.s32 %s1440_s26, %s1540_s28 }
   0xc   : > { %p308_p0 = scmp.ne.s32.totalorder %s1436_s25, %s1432_s24  ;;  %p296_p1 = scmp.eq.s32.totalorder %s295_s30, 0 }
   0xd   : > { %p309_p2 = scmp.eq.s32.totalorder %s1536_s10, 1  ;;  %p314_p3 = scmp.ne.s32.totalorder %s1432_s24, %s1428_s23 }
   0xe   : > { %p315_p4 = scmp.eq.s32.totalorder %s1206_s27, 1  ;;  %p1209_p7 = scmp.ge.s32.totalorder %s1440_s26, 1 }
   0xf   : > { %s1551_s13 = scalar_select %p296_p1, %s1436_s25, %s298_s29  }
  0x10   : > { %p1553_p5 = por %p309_p2, %p308_p0  ;;  %p1557_p6 = por %p315_p4, %p314_p3 }
  0x11   : > { %1768 = sst [smem:[#allocation10_spill]] %s1551_s13  ;;  %p414_p8 = scmp.lt.s32.totalorder %s1440_s26, 3 }
  0x13   : > { %p415_p9 = pnand %p1209_p7, %p414_p8 }
  0x14   : > { %p478_p10 = scmp.lt.s32.totalorder (!%p415_p9), %s1536_s10, 1  ;;  %s1771_s0 = sld [smem:[#allocation11_spill]] (!%p415_p9) }
  0x15   : > { %418 = sbr.rel (%p415_p9) target bundleno = 975 (0x3cf), region = 64  ;;  %s1772_s1 = sld [smem:[#allocation12_spill]] (!%p415_p9) }
  0x1a   : > { %v506_v0 = vld [vmem:[%s1756_s6 + $0x18] sm:$0xff]  ;;  %v1442_v2 = vmov 0.0   ;;  %v505_v3 = vld [vmem:[%s1756_s6 + $0x10] sm:$0xff]  ;;  %s1579_s29 = scalar_select %p478_p10, %s1536_s10, 1  ;;  %v504_v5 = vld [vmem:[%s1756_s6 + $0x8] sm:$0xff]  ;;  %vm514_vm0 = vcmask 261120  }
  0x1b   : > { %v592_v1 = vld [vmem:[%s1758_s8 + $0x18] sm:$0xff]  ;;  %1252 = vmatprep.subr.mxu0 %v1442_v2  ;;  %1263 = vmatprep.subr.mxu1 %v1442_v2  ;;  %v591_v4 = vld [vmem:[%s1758_s8 + $0x10] sm:$0xff]  ;;  %v590_v6 = vld [vmem:[%s1758_s8 + $0x8] sm:$0xff]  ;;  %vm1443_vm1 = vmmov 0   ;;  %v1444_v11 = vmov 0   ;;  %vm676_vm2 = vcmask 64512  }
  0x1c   : > { %1253 = vmatpush3.msra.mxu0 %v506_v0  ;;  %1264 = vmatpush3.msra.mxu1 %v592_v1  ;;  %s1590_s19 = sshll.u32 %s1579_s29, 3  ;;  %v503_v7 = vld [vmem:[%s1756_s6] sm:$0xff]  ;;  %s499_s25 = scalar_lea.vmem %s1755_s5, %s1579_s29 }
  0x1d   : > { %1254 = vmatprep.subr.mxu0 %v1442_v2  ;;  %1265 = vmatprep.subr.mxu1 %v1442_v2  ;;  %s481_s30 = scalar_lea.vmem %s1771_s0, %s1590_s19  ;;  %s492_s18 = scalar_lea.vmem %s1753_s3, %s1590_s19  ;;  %v589_v8 = vld [vmem:[%s1758_s8] sm:$0xff] }
  0x1e   : > { %1255 = vmatpush3.msra.mxu0 %v505_v3  ;;  %1266 = vmatpush3.msra.mxu1 %v591_v4  ;;  %v500_v9 = vld [vmem:[%s481_s30] sm:$0xff]  ;;  %s485_s20 = scalar_lea.vmem %s1772_s1, %s1590_s19  ;;  %s496_s27 = scalar_lea.vmem %s1754_s4, %s1590_s19 }
  0x1f   : > { %1256 = vmatprep.subr.mxu0 %v1442_v2  ;;  %1267 = vmatprep.subr.mxu1 %v1442_v2  ;;  %v501_v10 = vld [vmem:[%s492_s18] sm:$0xff]  ;;  %s502_s30 = sld [smem:[#allocation2]]  ;;  %s488_s21 = scalar_lea.vmem %s1752_s2, %s1579_s29 }
  0x20   : > { %1257 = vmatpush3.msra.mxu0 %v504_v5  ;;  %1268 = vmatpush3.msra.mxu1 %v590_v6  ;;  %v823_v12 = vld [vmem:[%s485_s20] sm:$0xff]  ;;  %s1661_s29 = sand.u32 1, %s1432_s24  }
  0x21   : > { %1258 = vmatprep.subr.mxu0 %v1442_v2  ;;  %1269 = vmatprep.subr.mxu1 %v1442_v2  ;;  %v825_v13 = vld [vmem:[%s496_s27] sm:$0xff]  ;;  %s1210_s22 = sshll.u32 %s1661_s29, 3  ;;  %s1764_s27 = sshll.u32 %s1536_s10, 7 }
  0x22   : > { %1259 = vmatpush3.msra.mxu0 %v503_v7  ;;  %1260 = vmatprep.mubr.msk.f32.mxu0 %vm1443_vm1, %v1442_v2  ;;  %v1216_v14 = vld [vmem:[%s1757_s7] ss:$0 sm:$0xff]  ;;  %s1670_s0 = scalar_lea.hbm %s1762_s12, %s1764_s27  ;;  %s1674_s19 = scalar_lea.vmem [#allocation3], %s1210_s22 }
  0x23   : > { %1270 = vmatpush3.msra.mxu1 %v589_v8  ;;  %1271 = vmatprep.mubr.msk.f32.mxu1 %vm1443_vm1, %v1442_v2  ;;  %v1218_v15 = vld [vmem:[%s1759_s9] ss:$0 sm:$0xff]  ;;  %s1035_s13 = scalar_lea.sflag [#allocation6], %s1661_s29 }
  0x24   : > { %1261 = vmatmul.mubr.msk.f32.vlgmr.msra.gmra.mxu0 %vm514_vm0, %v500_v9  ;;  %1272 = vmatmul.mubr.msk.f32.vlgmr.msra.gmra.mxu1 %vm514_vm0, %v501_v10  ;;  %v1224_v27 = vld [vmem:[%s499_s25] ss:$0 sm:$0xff] }
  0x25   : > { %1274 = vmatprep.subr.mxu0 %v1442_v2  ;;  %1279 = vmatprep.subr.mxu1 %v1442_v2  ;;  %v674_v20 = vstv %s502_s30  ;;  %v1225_v29 = vld [vmem:[%s488_s21] ss:$0 sm:$0xff]  ;;  %s477_s30 = scalar_lea.vmem [#allocation5], %s1210_s22  ;;  %s1445_s21 = smov [#allocation5]  }
  0x26   : > { %1276 = vmatprep.mubr.msk.f32.mxu0 %vm1443_vm1, %v1442_v2  ;;  %1281 = vmatprep.mubr.msk.f32.mxu1 %vm1443_vm1, %v1442_v2  ;;  %s1061_s16 = sshll.u32 %s477_s30, 4  ;;  %s1354_s17 = sshll.u32 %s1445_s21, 4  ;;  %s1672_s16 = int_to_ptr.vmem [resolvable:$true] %s1061_s16  ;;  %s1355_s17 = int_to_ptr.vmem [resolvable:$false] %s1354_s17 }
  0x27   : > { %1341 = vset.pattern.permute.xlu0 %v1444_v11  ;;  %s1350_s20 = scalar_lea.vmem %s1672_s16, 128  ;;  %s1356_s18 = scalar_lea.vmem %s1355_s17, 256 }
  0x28   : > { %829 = vperm.xlu0 %1341, %v823_v12   ;;  %p1351_p11 = scmp.ne.s32.totalorder %s1672_s16, %s1350_s20  ;;  %p1357_p0 = scmp.lt.s32.totalorder %s1672_s16, %s1355_s17 }
  0x29   : > { %p1358_p1 = scmp.lt.s32.totalorder %s1356_s18, %s1350_s20 }
  0x2a   : > { %p1352_p12 = pnand %p1351_p11, %p1553_p5 }
  0x2b   : > { %p1359_p2 = por %p1358_p1, %p1357_p0 }
  0x2c   : > { %841 = vperm.xlu0 %1341, %v825_v13   ;;  %p1353_p13 = pneg %p1352_p12 }
  0x2e   : > { %p1360_p3 = pnand %p1359_p2, %p1353_p13 }
  0xa3   : > { %v830_v26 = vpop.permute.xlu0 %829 }
  0xa4   : > { %v838_v28 = vmul.f32 %v1224_v27, %v830_v26 }
  0xa6   : > { %v852_v31 = vsub.f32 1.0, %v838_v28 }
  0xa7   : > { %v842_v30 = vpop.permute.xlu0 %841 }
  0xa8   : > { %v850_v32 = vmul.f32 %v1225_v29, %v842_v30  ;;  %v853_v33 = vmul.f32 -1e+09, %v852_v31 }
  0xaa   : > { %v856_v34 = vsub.f32 1.0, %v850_v32 }
  0xac   : > { %v857_v39 = vmul.f32 -1e+09, %v856_v34 }
  0xe4   : > { %v584_v16 = vpop.f32.mrf.mxu0  ;;  %v669_v17 = vpop.f32.mrf.mxu1 }
  0xe5   : > { %v585_v18 = vadd.f32 %v1216_v14, %v584_v16  ;;  %v670_v19 = vadd.f32 %v1218_v15, %v669_v17 }
  0xe6   : > { %v1262_v21 = vpop.f32.mrf.mxu0  ;;  %v1273_v22 = vpop.f32.mrf.mxu1 }
  0xe7   : > { %v588_v23 = vmax.f32 %v585_v18, 0.0  ;;  %v673_v24 = vmax.f32 %v670_v19, 0.0 }
  0xe9   : > { %v675_v25 = vmul.f32 %v674_v20, %v588_v23  ;;  %1275 = vmatpush3.xpose.msk.msra.mxu0 %vm676_vm2, %v673_v24 }
  0xea   : > { %1284 = vmatprep.subr.mxu0 %v1442_v2 }
  0xeb   : > { %1280 = vmatpush3.xpose.msk.msra.mxu1 %vm676_vm2, %v675_v25 }
  0xec   : > { %1277 = vmatmul.mubr.msk.f32.vlgmr.msra.gmra.mxu0 %vm676_vm2, %v675_v25  ;;  %1289 = vmatprep.subr.mxu1 %v1442_v2 }
  0xed   : > { %1285 = vmatpush3.msra.mxu0 %v500_v9  ;;  %1286 = vmatprep.mubr.msk.f32.mxu0 %vm1443_vm1, %v1442_v2 }
  0xee   : > { %1282 = vmatmul.mubr.msk.f32.vlgmr.msra.gmra.mxu1 %vm676_vm2, %v673_v24 }
  0xef   : > { %1290 = vmatpush3.msra.mxu1 %v501_v10  ;;  %1291 = vmatprep.mubr.msk.f32.mxu1 %vm1443_vm1, %v1442_v2 }
 0x1ac   : > { %v749_v35 = vpop.f32.mrf.mxu0 }
 0x1ad   : > { %v851_v36 = vmul.f32 %v838_v28, %v749_v35 }
 0x1ae   : > { %v1278_v37 = vpop.f32.mrf.mxu0  ;;  %v819_v38 = vpop.f32.mrf.mxu1 }
 0x1af   : > { %v855_v40 = vmul.f32 %v850_v32, %v819_v38  ;;  %v854_v41 = vadd.f32 %v853_v33, %v851_v36 }
 0x1b0   : > { %v1283_v42 = vpop.f32.mrf.mxu1 }
 0x1b1   : > { %v859_v43 = vsel %vm676_vm2, %v854_v41, -inf  ;;  %v858_v44 = vadd.f32 %v857_v39, %v855_v40 }
 0x1b2   : > { %860 = vmax.xlane.f32.xlu1 %v859_v43 }
 0x1b3   : > { %v870_v45 = vsel %vm676_vm2, %v858_v44, -inf }
 0x1b6   : > { %871 = vmax.xlane.f32.xlu1 %v870_v45 }
 0x23b   : > { %v861_v46 = vpop.xlane.xlu1 %860 }
 0x23c   : > { %v862_v47 = vsub.f32 %v854_v41, %v861_v46 }
 0x23e   : > { %v863_v48 = vmul.f32 1.442695, %v862_v47 }
 0x23f   : > { %v872_v49 = vpop.xlane.xlu1 %871 }
 0x240   : > { %1342 = vpow2.f32 %v863_v48  ;;  %v873_v50 = vsub.f32 %v858_v44, %v872_v49 }
 0x242   : > { %v874_v51 = vmul.f32 1.442695, %v873_v50 }
 0x244   : > { %1344 = vpow2.f32 %v874_v51 }
 0x24d   : > { %v1343_v52 = vpop.eup %1342 }
 0x24e   : > { %v865_v53 = vsel %vm676_vm2, %v1343_v52, 0.0 }
 0x24f   : > { %866 = vadd.xlane.f32.xlu0 %v865_v53 }
 0x251   : > { %v1345_v54 = vpop.eup %1344 }
 0x252   : > { %v876_v55 = vsel %vm676_vm2, %v1345_v54, 0.0 }
 0x253   : > { %877 = vadd.xlane.f32.xlu1 %v876_v55 }
 0x2d8   : > { %v867_v56 = vpop.xlane.xlu0 %866 }
 0x2d9   : > { %1346 = vrcp.f32 %v867_v56 }
 0x2dc   : > { %v878_v57 = vpop.xlane.xlu1 %877 }
 0x2dd   : > { %1348 = vrcp.f32 %v878_v57 }
 0x2e6   : > { %v1347_v58 = vpop.eup %1346 }
 0x2e7   : > { %v869_v59 = vmul.f32 %v1347_v58, %v1343_v52 }
 0x2e9   : > { %1292 = vmatmul.mubr.msk.f32.vlgmr.msra.gmra.mxu1 %vm676_vm2, %v869_v59 }
 0x2ea   : > { %v1349_v60 = vpop.eup %1348 }
 0x2eb   : > { %v880_v61 = vmul.f32 %v1349_v60, %v1345_v54 }
 0x2ed   : > { %1287 = vmatmul.mubr.msk.f32.vlgmr.msra.gmra.mxu0 %vm676_vm2, %v880_v61 }
 0x3a9   : > { %v1023_v62 = vpop.f32.mrf.mxu1 }
 0x3aa   : > { %1028 = vst.msk [vmem:[%s477_s30] sm:$0xff] %vm514_vm0, %v1023_v62 }
 0x3ab   : > { %v1293_v63 = vpop.f32.mrf.mxu1 }
 0x3ac   : > { %1363 = shalt.err (!%p1360_p3)
}
 0x3ad   : > { %s1364_s22 = scalar_lea.hbm %s1670_s0, 128  ;;  %s1368_s21 = scalar_lea.hbm %s1762_s12, 256 }
 0x3ae   : > { %p1365_p4 = scmp.ne.s32.totalorder %s1670_s0, %s1364_s22  ;;  %p1369_p9 = scmp.lt.s32.totalorder %s1670_s0, %s1762_s12 }
 0x3af   : > { %p1370_p10 = scmp.lt.s32.totalorder %s1368_s21, %s1364_s22 }
 0x3b0   : > { %p1366_p7 = pnand %p1365_p4, %p1553_p5 }
 0x3b1   : > { %p1371_p11 = por %p1370_p10, %p1369_p9 }
 0x3b2   : > { %p1367_p8 = pneg %p1366_p7 }
 0x3b4   : > { %p1372_p12 = pnand %p1371_p11, %p1367_p8 }
 0x3b6   : > { %1375 = shalt.err (!%p1372_p12)
}
 0x3b7   : > { %1295 = dma.vmem_to_hbm [thread:$0]  (%p1553_p5), %s1672_s16, 128, %s1670_s0, %s1035_s13   ;;  %v950_v0 = vpop.f32.mrf.mxu0 }
 0x3b8   : > { %s1773_s25 = sshll.u32 %s1536_s10, 7  ;;  %s1774_s27 = sshll.u32 %s1674_s19, 4  ;;  %1027 = vst.msk [vmem:[%s1674_s19] sm:$0xff] %vm514_vm0, %v950_v0  ;;  %s1708_s27 = int_to_ptr.vmem [resolvable:$true] %s1774_s27 }
 0x3b9   : > { %s1704_s1 = scalar_lea.hbm %s1761_s11, %s1773_s25  ;;  %v1288_v1 = vpop.f32.mrf.mxu0  ;;  %s1030_s18 = scalar_lea.sflag [#allocation4], %s1661_s29 }
 0x3ba   : > { %s1376_s22 = scalar_lea.vmem %s1708_s27, 128  ;;  %s1446_s10 = smov [#allocation3]  }
 0x3bb   : > { %p1377_p13 = scmp.ne.s32.totalorder %s1708_s27, %s1376_s22  ;;  %s1380_s16 = sshll.u32 %s1446_s10, 4  ;;  %s1381_s16 = int_to_ptr.vmem [resolvable:$false] %s1380_s16 }
 0x3bc   : > { %s1382_s0 = scalar_lea.vmem %s1381_s16, 256  ;;  %p1383_p2 = scmp.lt.s32.totalorder %s1708_s27, %s1381_s16 }
 0x3bd   : > { %p1378_p0 = pnand %p1377_p13, %p1553_p5  ;;  %p1384_p3 = scmp.lt.s32.totalorder %s1382_s0, %s1376_s22 }
 0x3bf   : > { %p1379_p1 = pneg %p1378_p0  ;;  %p1385_p4 = por %p1384_p3, %p1383_p2 }
 0x3c1   : > { %p1386_p7 = pnand %p1385_p4, %p1379_p1 }
 0x3c3   : > { %1389 = shalt.err (!%p1386_p7)
}
 0x3c4   : > { %s1390_s19 = scalar_lea.hbm %s1704_s1, 128  ;;  %s1394_s30 = scalar_lea.hbm %s1761_s11, 256 }
 0x3c5   : > { %p1391_p8 = scmp.ne.s32.totalorder %s1704_s1, %s1390_s19  ;;  %p1395_p11 = scmp.lt.s32.totalorder %s1704_s1, %s1761_s11 }
 0x3c6   : > { %p1396_p12 = scmp.lt.s32.totalorder %s1394_s30, %s1390_s19 }
 0x3c7   : > { %p1392_p9 = pnand %p1391_p8, %p1553_p5 }
 0x3c8   : > { %p1397_p13 = por %p1396_p12, %p1395_p11 }
 0x3c9   : > { %p1393_p10 = pneg %p1392_p9 }
 0x3cb   : > { %p1398_p0 = pnand %p1397_p13, %p1393_p10 }
 0x3cd   : > { %1401 = shalt.err (!%p1398_p0)
}
 0x3ce   : > { %1294 = dma.vmem_to_hbm [thread:$0]  (%p1553_p5), %s1708_s27, 128, %s1704_s1, %s1030_s18  }
 0x3cf PF: > { %p1305_p1 = scmp.ge.s32.totalorder %s1440_s26, 2  ;;  %s1073_s20 = sand.u32 1, %s1428_s23  }
 0x3d0   : > { %s1074_s17 = scalar_lea.sflag [#allocation4], %s1073_s20 }
 0x3d1   : > { %p1299_p2 = pnand %p1305_p1, %p1557_p6 }
 0x3d3   : > { %p1300_p3 = pneg %p1299_p2 }
 0x3d5   : > { %1419 = dma.done.wait (%p1300_p3), %s1074_s17, 128  }
 0x3d6   : > { %1421 = vsyncadd (%p1300_p3), %s1074_s17, 4294967168  ;;  %s1083_s22 = scalar_lea.sflag [#allocation6], %s1073_s20 }
 0x3d7   : > { %1423 = dma.done.wait (%p1300_p3), %s1083_s22, 128  }
 0x3d8   : > { %1425 = vsyncadd (%p1300_p3), %s1083_s22, 4294967168  ;;  %s1775_s14 = sld [smem:[#allocation9_spill]]  ;;  %p27_p5 = scmp.ge.s32.totalorder %s1540_s28, 4  }
 0x3d9   : > { %s1776_s25 = sld [smem:[#allocation10_spill]]  ;;  %s1777_s23 = smov %s1432_s24 }
 0x3da   : > { %s1779_s26 = smov %s1540_s28  ;;  %29 = sbr.rel (!%p27_p5) target bundleno = 9 (0x9), region = 131 }
 0x3de   : > { %s1778_s24 = smov %s1775_s14 }
 0x3df   :  { %1088 = vsyncpa [#allocation4], 1 }
 0x3e0   :  { %1090 = vsyncpa [#allocation4 + $0x1], 1 }
 0x3e1   :  { %1091 = vsyncpa [#allocation6], 1 }
 0x3e2   :  { %1093 = vsyncpa [#allocation6 + $0x1], 1 }

</bundles_post_ra>
